<compile_context>
chip_gen: v5e
topology: v5e:2x2
jax: 0.10.0
libtpu: 0.0.40
codegen_flags: <defaults>
</compile_context>

<pallas_src>
import numpy as np
import jax
import jax.numpy as jnp
from jax.experimental import pallas as pl
from jax.experimental.pallas import tpu as pltpu

# ---- deterministic "weights" (compile-time constants) -----------------------
SOBEL_X = ((-1.0, 0.0, 1.0),
           (-2.0, 0.0, 2.0),
           (-1.0, 0.0, 1.0))
SOBEL_Y = ((-1.0, -2.0, -1.0),
           ( 0.0,  0.0,  0.0),
           ( 1.0,  2.0,  1.0))

# SIFTOrientationLayer: theta = linspace(0, 2pi, 9)[:-1] + pi/8
_theta = (np.pi / 8.0) + np.arange(8, dtype=np.float64) * (np.pi / 4.0)
WX = np.cos(_theta).astype(np.float32)   # x-components of the 8 bin vectors
WY = np.sin(_theta).astype(np.float32)   # y-components of the 8 bin vectors

_HALO = 8                            # halo rows fetched below each tile (5 needed)
_VMEM_BUDGET = 36 * 1024 * 1024      # per-step working-set budget (fits v7x 64 MiB)


def _round_up(a, b):
    return ((a + b - 1) // b) * b


def _cdiv(a, b):
    return (a + b - 1) // b


def _vmem_estimate(TM, W_IN, W_LANE):
    f32 = 4
    slab = (TM + _HALO) * W_IN * f32                 # stitch scratch
    in_bufs = 2 * (TM + _HALO) * W_IN * f32          # double-buffered input blocks
    out_bufs = 2 * 8 * TM * W_LANE * f32             # double-buffered output block
    interm = 12 * (TM + 3) * W_IN * f32              # live f32 temporaries
    return slab + in_bufs + out_bufs + interm


def _make_siftnet_kernel(M, N, TM, W_IN, N_OUT):
    """M, N: real image size. TM: output rows per tile (mult of 8). W_IN: padded
    slab/plane width (mult of 128, >= N+4). N_OUT = N+1 (exact output width).
    Column convention: image col c sits at slab col c+3; plane col q corresponds
    to image col q-2 (i.e. histogram value at image col q-2)."""
    TH = TM + 3      # histogram rows a tile needs (output rows -2 .. +1)
    s1 = W_IN - 1    # pltpu.roll by W_IN-k  ==  shift left by k columns
    s2 = W_IN - 2

    def kernel(main_ref, halo_ref, out_ref, slab_ref):
        t = pl.program_id(0)

        # Stitch the TM-row main block and the 8-row halo block into one aligned
        # (TM+8, W_IN) slab (offsets 0 and TM are multiples of 8 -> unmasked
        # stores).  Fully overwritten each grid step.
        slab_ref[0:TM, :] = main_ref[...]
        slab_ref[TM:TM + _HALO, :] = halo_ref[...]
        x = slab_ref[...]

        # ---- 1. Sobel gradients, separable ----------------------------------
        # hist row h (global hist row t*TM - 2 + h) uses slab rows h, h+1, h+2.
        x0 = x[0:TH, :]
        x1 = x[1:TH + 1, :]
        x2 = x[2:TH + 2, :]
        sx = x0 + 2.0 * x1 + x2                 # vertical [1, 2, 1]
        sy = x2 - x0                            # vertical [-1, 0, 1]
        # horizontal stage: lane rolls (XLU); plane col q uses slab cols q..q+2.
        # Wrapped-in lanes are the zero left margin (cols 0..2) and only land on
        # columns that are masked invalid anyway.
        ix = pltpu.roll(sx, s2, 1) - sx                                   # [-1,0,1]
        iy = sy + 2.0 * pltpu.roll(sy, s1, 1) + pltpu.roll(sy, s2, 1)     # [ 1,2,1]

        # ---- validity mask: histogram rows/cols outside the image are zero ---
        row_g = (t * TM - 2) + jax.lax.broadcasted_iota(jnp.int32, (TH, W_IN), 0)
        col_q = jax.lax.broadcasted_iota(jnp.int32, (TH, W_IN), 1)
        valid = (row_g >= 0) & (row_g < M) & (col_q >= 2) & (col_q < N + 2)

        # ---- 2 + 3. orientation cosines (VPU) + first-max argmax + magnitude -
        mag = jnp.where(valid, jnp.sqrt(ix * ix + iy * iy), 0.0)
        best_val = jnp.float32(WX[0]) * ix + jnp.float32(WY[0]) * iy
        best_idx = jnp.zeros((TH, W_IN), jnp.int32)
        for c in range(1, 8):
            cos_c = jnp.float32(WX[c]) * ix + jnp.float32(WY[c]) * iy
            take = cos_c > best_val                  # strict '>' keeps first max
            best_val = jnp.where(take, cos_c, best_val)
            best_idx = jnp.where(take, jnp.int32(c), best_idx)

        # ---- 4. per-bin masked magnitude + separable 4x4 box sum -------------
        # out row i needs hist rows i-2..i+1 -> plane rows i..i+3  (2-level: 2 adds)
        # out col j needs hist cols j-2..j+1 -> plane cols j..j+3  (2-level: 2 adds)
        for c in range(8):
            plane = jnp.where(best_idx == c, mag, 0.0)                 # (TH, W_IN)
            tv = plane[0:TM + 2, :] + plane[1:TM + 3, :]               # pairwise rows
            vs = tv[0:TM, :] + tv[2:TM + 2, :]                         # (TM, W_IN)
            hp = vs + pltpu.roll(vs, s1, 1)                            # pairwise cols
            hs = hp + pltpu.roll(hp, s2, 1)                            # (TM, W_IN)
            out_ref[c, :, :] = hs[:, 0:N_OUT]                          # exact-width store

    return kernel


def siftnet_forward(x, *, tile_m=128):
    """x: (1, 1, M, N) float32 (NCHW, like PyTorch). Returns (1, 8, M+1, N+1)."""
    assert x.ndim == 4 and x.shape[0] == 1 and x.shape[1] == 1
    M, N = int(x.shape[2]), int(x.shape[3])
    M_OUT, N_OUT = M + 1, N + 1

    W_IN = _round_up(N_OUT, 128)           # slab / plane width (lane-aligned)
    if W_IN < N + 4:                       # need 3-col left margin + 1 zero col right
        W_IN += 128
    W_LANE = _round_up(N_OUT, 128)         # VMEM lane padding of the output block

    # Tile size: as large as the per-step VMEM budget allows (v7x-safe), but split
    # into >= 2 tiles when possible so both TensorCores get work under "parallel".
    TM = _round_up(min(tile_m, M_OUT), 8)
    while TM > 8 and _vmem_estimate(TM, W_IN, W_LANE) > _VMEM_BUDGET:
        TM = max(8, _round_up(TM // 2, 8))
    GR = _cdiv(M_OUT, TM)
    if GR == 1 and M_OUT > 8:
        TM = _round_up(_cdiv(M_OUT, 2), 8)
        GR = _cdiv(M_OUT, TM)

    # Zero-padded image plane: 3 zero rows on top (1 Sobel + 2 box-filter halo),
    # zero fill at the bottom so every tile's (TM+8)-row slab stays in bounds;
    # 3 zero cols on the left, zero fill on the right to W_IN.
    rows_pad = GR * TM + _HALO
    img = x[0, 0].astype(jnp.float32)
    img_pad = jnp.pad(img, ((3, rows_pad - 3 - M), (3, W_IN - 3 - N)))

    kernel = _make_siftnet_kernel(M, N, TM, W_IN, N_OUT)
    nblk = TM // 8

    vmem_limit = int(min(56 * 1024 * 1024,
                         max(32 * 1024 * 1024,
                             int(1.4 * _vmem_estimate(TM, W_IN, W_LANE)))))

    out = pl.pallas_call(
        kernel,
        # Exact output shape: no wrapper-side crop / extra HBM pass. Pallas masks
        # the ragged last row block and the non-128 lane extent on writeback.
        out_shape=jax.ShapeDtypeStruct((8, M_OUT, N_OUT), jnp.float32),
        grid=(GR,),
        in_specs=[
            # main TM-row block of the padded image for this tile
            pl.BlockSpec((TM, W_IN), lambda t: (t, 0)),
            # 8-row halo block immediately below it: a second blocked view of the
            # SAME array, so BlockSpecs never overlap -> auto double-buffered DMA,
            # safe under "parallel" grid partitioning, no HBM duplication.
            pl.BlockSpec((_HALO, W_IN), lambda t: ((t + 1) * nblk, 0)),
        ],
        out_specs=pl.BlockSpec((8, TM, N_OUT), lambda t: (0, t, 0)),
        scratch_shapes=[pltpu.VMEM((TM + _HALO, W_IN), jnp.float32)],
        compiler_params=pltpu.CompilerParams(
            dimension_semantics=("parallel",),          # megacore sharding on v7x
            vmem_limit_bytes=vmem_limit,
        ),
    )(img_pad, img_pad)

    return out[None]


def siftnet_reference(x):
    """Pure-JAX (XLA) reference with the PyTorch SIFTNet semantics."""
    img = x[0, 0].astype(jnp.float32)
    M, N = img.shape
    p = jnp.pad(img, 1)
    ix = jnp.zeros((M, N), jnp.float32)
    iy = jnp.zeros((M, N), jnp.float32)
    for a in range(3):
        for b in range(3):
            w = p[a:a + M, b:b + N]
            ix = ix + SOBEL_X[a][b] * w
            iy = iy + SOBEL_Y[a][b] * w
    mag = jnp.sqrt(ix * ix + iy * iy)
    cos = jnp.stack([WX[c] * ix + WY[c] * iy for c in range(8)], axis=0)
    idx = jnp.argmax(cos, axis=0)
    hist = jnp.where(jnp.arange(8)[:, None, None] == idx[None], mag[None], 0.0)
    hp = jnp.pad(hist, ((0, 0), (2, 2), (2, 2)))
    out = jnp.zeros((8, M + 1, N + 1), jnp.float32)
    for a in range(4):
        for b in range(4):
            out = out + hp[:, a:a + M + 1, b:b + N + 1]
    return out[None]


if __name__ == "__main__":
    key = jax.random.PRNGKey(0)
    # (M, N, tile_m): case 2 exercises a multi-tile grid with uneven division,
    # halo stitching and row/column masking; case 3 exercises the default tile
    # path (GR-split for two cores) and the W_IN bump guard (N+4 > round_up(N+1)).
    for (M, N, tm) in [(16, 16, 8), (24, 20, 16), (20, 125, 128)]:
        key, sub = jax.random.split(key)
        x = jax.random.normal(sub, (1, 1, M, N), dtype=jnp.float32)

        out = jax.block_until_ready(siftnet_forward(x, tile_m=tm))
        assert out.shape == (1, 8, M + 1, N + 1), out.shape
        assert bool(jnp.all(jnp.isfinite(out)))

        ref = jax.block_until_ready(siftnet_reference(x))
        max_err = float(jnp.max(jnp.abs(out - ref)))
        assert max_err < 5e-3, f"mismatch vs reference: {max_err}"

    print("KERNEL_OK")
</pallas_src>

<mosaic_0001>
module attributes {stable_mosaic.version = 11 : i64} {
  func.func @kernel(%arg0: i32, %arg1: memref<8x128xf32, #tpu.memory_space<vmem>>, %arg2: memref<8x128xf32, #tpu.memory_space<vmem>>, %arg3: memref<8x8x17xf32, #tpu.memory_space<vmem>>, %arg4: memref<16x128xf32, #tpu.memory_space<vmem>>) attributes {dimension_semantics = [#tpu.dimension_semantics<parallel>], iteration_bounds = array<i64: 3>, scalar_prefetch = 0 : i64, scratch_operands = 1 : i64, tpu.core_type = #tpu.core_type<tc>, window_params = [{transform_indices = @transform_0, window_bounds = array<i64: 8, 128>}, {transform_indices = @transform_1, window_bounds = array<i64: 8, 128>}, {transform_indices = @transform_2, window_bounds = array<i64: 8, 8, 17>}]} {
    %c0 = arith.constant 0 : index
    %c0_0 = arith.constant 0 : index
    %0 = vector.load %arg1[%c0, %c0_0] : memref<8x128xf32, #tpu.memory_space<vmem>>, vector<8x128xf32>
    %c0_1 = arith.constant 0 : index
    %c0_2 = arith.constant 0 : index
    %1 = vector.load %arg4[%c0_1, %c0_2] : memref<16x128xf32, #tpu.memory_space<vmem>>, vector<8x128xf32>
    tpu.vector_store %arg4[%c0_1, %c0_2], %0 {strides = array<i32>} : memref<16x128xf32, #tpu.memory_space<vmem>>, vector<8x128xf32>,
    %c0_3 = arith.constant 0 : index
    %c0_4 = arith.constant 0 : index
    %2 = vector.load %arg2[%c0_3, %c0_4] : memref<8x128xf32, #tpu.memory_space<vmem>>, vector<8x128xf32>
    %c8 = arith.constant 8 : index
    %c0_5 = arith.constant 0 : index
    %3 = vector.load %arg4[%c8, %c0_5] : memref<16x128xf32, #tpu.memory_space<vmem>>, vector<8x128xf32>
    tpu.vector_store %arg4[%c8, %c0_5], %2 {strides = array<i32>} : memref<16x128xf32, #tpu.memory_space<vmem>>, vector<8x128xf32>,
    %c0_6 = arith.constant 0 : index
    %c0_7 = arith.constant 0 : index
    %4 = vector.load %arg4[%c0_6, %c0_7] : memref<16x128xf32, #tpu.memory_space<vmem>>, vector<16x128xf32>
    %5 = vector.extract_strided_slice %4 {offsets = [0, 0], sizes = [11, 128], strides = [1, 1]} : vector<16x128xf32> to vector<11x128xf32>
    %6 = vector.extract_strided_slice %4 {offsets = [1, 0], sizes = [11, 128], strides = [1, 1]} : vector<16x128xf32> to vector<11x128xf32>
    %7 = vector.extract_strided_slice %4 {offsets = [2, 0], sizes = [11, 128], strides = [1, 1]} : vector<16x128xf32> to vector<11x128xf32>
    %cst = arith.constant 2.000000e+00 : f32
    %8 = vector.broadcast %cst : f32 to vector<11x128xf32>
    %9 = arith.mulf %8, %6 : vector<11x128xf32>
    %10 = arith.addf %5, %9 : vector<11x128xf32>
    %11 = arith.addf %10, %7 : vector<11x128xf32>
    %12 = arith.subf %7, %5 : vector<11x128xf32>
    %c126_i32 = arith.constant 126 : i32
    %13 = tpu.dynamic_rotate %11 by %c126_i32 dim 1 : vector<11x128xf32>, i32 -> vector<11x128xf32>
    %14 = arith.subf %13, %11 : vector<11x128xf32>
    %c127_i32 = arith.constant 127 : i32
    %15 = tpu.dynamic_rotate %12 by %c127_i32 dim 1 : vector<11x128xf32>, i32 -> vector<11x128xf32>
    %cst_8 = arith.constant 2.000000e+00 : f32
    %16 = vector.broadcast %cst_8 : f32 to vector<11x128xf32>
    %17 = arith.mulf %16, %15 : vector<11x128xf32>
    %18 = arith.addf %12, %17 : vector<11x128xf32>
    %c126_i32_9 = arith.constant 126 : i32
    %19 = tpu.dynamic_rotate %12 by %c126_i32_9 dim 1 : vector<11x128xf32>, i32 -> vector<11x128xf32>
    %20 = arith.addf %18, %19 : vector<11x128xf32>
    %c8_i32 = arith.constant 8 : i32
    %21 = arith.muli %arg0, %c8_i32 : i32
    %c2_i32 = arith.constant 2 : i32
    %22 = arith.subi %21, %c2_i32 : i32
    %23 = tpu.iota {dimensions = array<i32: 0>} : vector<11x128xi32>
    %24 = vector.broadcast %22 : i32 to vector<11x128xi32>
    %25 = arith.addi %24, %23 : vector<11x128xi32>
    %26 = tpu.iota {dimensions = array<i32: 1>} : vector<11x128xi32>
    %c0_i32 = arith.constant 0 : i32
    %27 = vector.broadcast %c0_i32 : i32 to vector<11x128xi32>
    %28 = arith.cmpi sge, %25, %27 : vector<11x128xi32>
    %c16_i32 = arith.constant 16 : i32
    %29 = vector.broadcast %c16_i32 : i32 to vector<11x128xi32>
    %30 = arith.cmpi slt, %25, %29 : vector<11x128xi32>
    %31 = arith.andi %28, %30 : vector<11x128xi1>
    %c2_i32_10 = arith.constant 2 : i32
    %32 = vector.broadcast %c2_i32_10 : i32 to vector<11x128xi32>
    %33 = arith.cmpi sge, %26, %32 : vector<11x128xi32>
    %34 = arith.andi %31, %33 : vector<11x128xi1>
    %c18_i32 = arith.constant 18 : i32
    %35 = vector.broadcast %c18_i32 : i32 to vector<11x128xi32>
    %36 = arith.cmpi slt, %26, %35 : vector<11x128xi32>
    %37 = arith.andi %34, %36 : vector<11x128xi1>
    %38 = arith.mulf %14, %14 : vector<11x128xf32>
    %39 = arith.mulf %20, %20 : vector<11x128xf32>
    %40 = arith.addf %38, %39 : vector<11x128xf32>
    %41 = math.sqrt %40 : vector<11x128xf32>
    %cst_11 = arith.constant 0.000000e+00 : f32
    %42 = vector.broadcast %cst_11 : f32 to vector<11x128xf32>
    %43 = arith.select %37, %41, %42 : vector<11x128xi1>, vector<11x128xf32>
    %cst_12 = arith.constant 0.923879504 : f32
    %44 = vector.broadcast %cst_12 : f32 to vector<11x128xf32>
    %45 = arith.mulf %44, %14 : vector<11x128xf32>
    %cst_13 = arith.constant 0.382683426 : f32
    %46 = vector.broadcast %cst_13 : f32 to vector<11x128xf32>
    %47 = arith.mulf %46, %20 : vector<11x128xf32>
    %48 = arith.addf %45, %47 : vector<11x128xf32>
    %c0_i32_14 = arith.constant 0 : i32
    %49 = vector.broadcast %c0_i32_14 : i32 to vector<11x128xi32>
    %cst_15 = arith.constant 0.382683426 : f32
    %50 = vector.broadcast %cst_15 : f32 to vector<11x128xf32>
    %51 = arith.mulf %50, %14 : vector<11x128xf32>
    %cst_16 = arith.constant 0.923879504 : f32
    %52 = vector.broadcast %cst_16 : f32 to vector<11x128xf32>
    %53 = arith.mulf %52, %20 : vector<11x128xf32>
    %54 = arith.addf %51, %53 : vector<11x128xf32>
    %55 = arith.cmpf ogt, %54, %48 : vector<11x128xf32>
    %56 = arith.select %55, %54, %48 : vector<11x128xi1>, vector<11x128xf32>
    %c1_i32 = arith.constant 1 : i32
    %57 = vector.broadcast %c1_i32 : i32 to vector<11x128xi32>
    %58 = arith.select %55, %57, %49 : vector<11x128xi1>, vector<11x128xi32>
    %cst_17 = arith.constant -0.382683426 : f32
    %59 = vector.broadcast %cst_17 : f32 to vector<11x128xf32>
    %60 = arith.mulf %59, %14 : vector<11x128xf32>
    %cst_18 = arith.constant 0.923879504 : f32
    %61 = vector.broadcast %cst_18 : f32 to vector<11x128xf32>
    %62 = arith.mulf %61, %20 : vector<11x128xf32>
    %63 = arith.addf %60, %62 : vector<11x128xf32>
    %64 = arith.cmpf ogt, %63, %56 : vector<11x128xf32>
    %65 = arith.select %64, %63, %56 : vector<11x128xi1>, vector<11x128xf32>
    %c2_i32_19 = arith.constant 2 : i32
    %66 = vector.broadcast %c2_i32_19 : i32 to vector<11x128xi32>
    %67 = arith.select %64, %66, %58 : vector<11x128xi1>, vector<11x128xi32>
    %cst_20 = arith.constant -0.923879504 : f32
    %68 = vector.broadcast %cst_20 : f32 to vector<11x128xf32>
    %69 = arith.mulf %68, %14 : vector<11x128xf32>
    %cst_21 = arith.constant 0.382683426 : f32
    %70 = vector.broadcast %cst_21 : f32 to vector<11x128xf32>
    %71 = arith.mulf %70, %20 : vector<11x128xf32>
    %72 = arith.addf %69, %71 : vector<11x128xf32>
    %73 = arith.cmpf ogt, %72, %65 : vector<11x128xf32>
    %74 = arith.select %73, %72, %65 : vector<11x128xi1>, vector<11x128xf32>
    %c3_i32 = arith.constant 3 : i32
    %75 = vector.broadcast %c3_i32 : i32 to vector<11x128xi32>
    %76 = arith.select %73, %75, %67 : vector<11x128xi1>, vector<11x128xi32>
    %cst_22 = arith.constant -0.923879504 : f32
    %77 = vector.broadcast %cst_22 : f32 to vector<11x128xf32>
    %78 = arith.mulf %77, %14 : vector<11x128xf32>
    %cst_23 = arith.constant -0.382683426 : f32
    %79 = vector.broadcast %cst_23 : f32 to vector<11x128xf32>
    %80 = arith.mulf %79, %20 : vector<11x128xf32>
    %81 = arith.addf %78, %80 : vector<11x128xf32>
    %82 = arith.cmpf ogt, %81, %74 : vector<11x128xf32>
    %83 = arith.select %82, %81, %74 : vector<11x128xi1>, vector<11x128xf32>
    %c4_i32 = arith.constant 4 : i32
    %84 = vector.broadcast %c4_i32 : i32 to vector<11x128xi32>
    %85 = arith.select %82, %84, %76 : vector<11x128xi1>, vector<11x128xi32>
    %cst_24 = arith.constant -0.382683426 : f32
    %86 = vector.broadcast %cst_24 : f32 to vector<11x128xf32>
    %87 = arith.mulf %86, %14 : vector<11x128xf32>
    %cst_25 = arith.constant -0.923879504 : f32
    %88 = vector.broadcast %cst_25 : f32 to vector<11x128xf32>
    %89 = arith.mulf %88, %20 : vector<11x128xf32>
    %90 = arith.addf %87, %89 : vector<11x128xf32>
    %91 = arith.cmpf ogt, %90, %83 : vector<11x128xf32>
    %92 = arith.select %91, %90, %83 : vector<11x128xi1>, vector<11x128xf32>
    %c5_i32 = arith.constant 5 : i32
    %93 = vector.broadcast %c5_i32 : i32 to vector<11x128xi32>
    %94 = arith.select %91, %93, %85 : vector<11x128xi1>, vector<11x128xi32>
    %cst_26 = arith.constant 0.382683426 : f32
    %95 = vector.broadcast %cst_26 : f32 to vector<11x128xf32>
    %96 = arith.mulf %95, %14 : vector<11x128xf32>
    %cst_27 = arith.constant -0.923879504 : f32
    %97 = vector.broadcast %cst_27 : f32 to vector<11x128xf32>
    %98 = arith.mulf %97, %20 : vector<11x128xf32>
    %99 = arith.addf %96, %98 : vector<11x128xf32>
    %100 = arith.cmpf ogt, %99, %92 : vector<11x128xf32>
    %101 = arith.select %100, %99, %92 : vector<11x128xi1>, vector<11x128xf32>
    %c6_i32 = arith.constant 6 : i32
    %102 = vector.broadcast %c6_i32 : i32 to vector<11x128xi32>
    %103 = arith.select %100, %102, %94 : vector<11x128xi1>, vector<11x128xi32>
    %cst_28 = arith.constant 0.923879504 : f32
    %104 = vector.broadcast %cst_28 : f32 to vector<11x128xf32>
    %105 = arith.mulf %104, %14 : vector<11x128xf32>
    %cst_29 = arith.constant -0.382683426 : f32
    %106 = vector.broadcast %cst_29 : f32 to vector<11x128xf32>
    %107 = arith.mulf %106, %20 : vector<11x128xf32>
    %108 = arith.addf %105, %107 : vector<11x128xf32>
    %109 = arith.cmpf ogt, %108, %101 : vector<11x128xf32>
    %c7_i32 = arith.constant 7 : i32
    %110 = vector.broadcast %c7_i32 : i32 to vector<11x128xi32>
    %111 = arith.select %109, %110, %103 : vector<11x128xi1>, vector<11x128xi32>
    %c0_i32_30 = arith.constant 0 : i32
    %112 = vector.broadcast %c0_i32_30 : i32 to vector<11x128xi32>
    %113 = arith.cmpi eq, %111, %112 : vector<11x128xi32>
    %cst_31 = arith.constant 0.000000e+00 : f32
    %114 = vector.broadcast %cst_31 : f32 to vector<11x128xf32>
    %115 = arith.select %113, %43, %114 : vector<11x128xi1>, vector<11x128xf32>
    %116 = vector.extract_strided_slice %115 {offsets = [0, 0], sizes = [10, 128], strides = [1, 1]} : vector<11x128xf32> to vector<10x128xf32>
    %117 = vector.extract_strided_slice %115 {offsets = [1, 0], sizes = [10, 128], strides = [1, 1]} : vector<11x128xf32> to vector<10x128xf32>
    %118 = arith.addf %116, %117 : vector<10x128xf32>
    %119 = vector.extract_strided_slice %118 {offsets = [0, 0], sizes = [8, 128], strides = [1, 1]} : vector<10x128xf32> to vector<8x128xf32>
    %120 = vector.extract_strided_slice %118 {offsets = [2, 0], sizes = [8, 128], strides = [1, 1]} : vector<10x128xf32> to vector<8x128xf32>
    %121 = arith.addf %119, %120 : vector<8x128xf32>
    %c127_i32_32 = arith.constant 127 : i32
    %122 = tpu.dynamic_rotate %121 by %c127_i32_32 dim 1 : vector<8x128xf32>, i32 -> vector<8x128xf32>
    %123 = arith.addf %121, %122 : vector<8x128xf32>
    %c126_i32_33 = arith.constant 126 : i32
    %124 = tpu.dynamic_rotate %123 by %c126_i32_33 dim 1 : vector<8x128xf32>, i32 -> vector<8x128xf32>
    %125 = arith.addf %123, %124 : vector<8x128xf32>
    %126 = vector.extract_strided_slice %125 {offsets = [0, 0], sizes = [8, 17], strides = [1, 1]} : vector<8x128xf32> to vector<8x17xf32>
    %c0_34 = arith.constant 0 : index
    %c0_35 = arith.constant 0 : index
    %c0_36 = arith.constant 0 : index
    %127 = vector.load %arg3[%c0_34, %c0_35, %c0_36] : memref<8x8x17xf32, #tpu.memory_space<vmem>>, vector<1x8x17xf32>
    %128 = vector.shape_cast %127 : vector<1x8x17xf32> to vector<8x17xf32>
    %129 = vector.shape_cast %126 : vector<8x17xf32> to vector<1x8x17xf32>
    tpu.vector_store %arg3[%c0_34, %c0_35, %c0_36], %129 {strides = array<i32>} : memref<8x8x17xf32, #tpu.memory_space<vmem>>, vector<1x8x17xf32>,
    %c1_i32_37 = arith.constant 1 : i32
    %130 = vector.broadcast %c1_i32_37 : i32 to vector<11x128xi32>
    %131 = arith.cmpi eq, %111, %130 : vector<11x128xi32>
    %cst_38 = arith.constant 0.000000e+00 : f32
    %132 = vector.broadcast %cst_38 : f32 to vector<11x128xf32>
    %133 = arith.select %131, %43, %132 : vector<11x128xi1>, vector<11x128xf32>
    %134 = vector.extract_strided_slice %133 {offsets = [0, 0], sizes = [10, 128], strides = [1, 1]} : vector<11x128xf32> to vector<10x128xf32>
    %135 = vector.extract_strided_slice %133 {offsets = [1, 0], sizes = [10, 128], strides = [1, 1]} : vector<11x128xf32> to vector<10x128xf32>
    %136 = arith.addf %134, %135 : vector<10x128xf32>
    %137 = vector.extract_strided_slice %136 {offsets = [0, 0], sizes = [8, 128], strides = [1, 1]} : vector<10x128xf32> to vector<8x128xf32>
    %138 = vector.extract_strided_slice %136 {offsets = [2, 0], sizes = [8, 128], strides = [1, 1]} : vector<10x128xf32> to vector<8x128xf32>
    %139 = arith.addf %137, %138 : vector<8x128xf32>
    %c127_i32_39 = arith.constant 127 : i32
    %140 = tpu.dynamic_rotate %139 by %c127_i32_39 dim 1 : vector<8x128xf32>, i32 -> vector<8x128xf32>
    %141 = arith.addf %139, %140 : vector<8x128xf32>
    %c126_i32_40 = arith.constant 126 : i32
    %142 = tpu.dynamic_rotate %141 by %c126_i32_40 dim 1 : vector<8x128xf32>, i32 -> vector<8x128xf32>
    %143 = arith.addf %141, %142 : vector<8x128xf32>
    %144 = vector.extract_strided_slice %143 {offsets = [0, 0], sizes = [8, 17], strides = [1, 1]} : vector<8x128xf32> to vector<8x17xf32>
    %c1 = arith.constant 1 : index
    %c0_41 = arith.constant 0 : index
    %c0_42 = arith.constant 0 : index
    %145 = vector.load %arg3[%c1, %c0_41, %c0_42] : memref<8x8x17xf32, #tpu.memory_space<vmem>>, vector<1x8x17xf32>
    %146 = vector.shape_cast %145 : vector<1x8x17xf32> to vector<8x17xf32>
    %147 = vector.shape_cast %144 : vector<8x17xf32> to vector<1x8x17xf32>
    tpu.vector_store %arg3[%c1, %c0_41, %c0_42], %147 {strides = array<i32>} : memref<8x8x17xf32, #tpu.memory_space<vmem>>, vector<1x8x17xf32>,
    %c2_i32_43 = arith.constant 2 : i32
    %148 = vector.broadcast %c2_i32_43 : i32 to vector<11x128xi32>
    %149 = arith.cmpi eq, %111, %148 : vector<11x128xi32>
    %cst_44 = arith.constant 0.000000e+00 : f32
    %150 = vector.broadcast %cst_44 : f32 to vector<11x128xf32>
    %151 = arith.select %149, %43, %150 : vector<11x128xi1>, vector<11x128xf32>
    %152 = vector.extract_strided_slice %151 {offsets = [0, 0], sizes = [10, 128], strides = [1, 1]} : vector<11x128xf32> to vector<10x128xf32>
    %153 = vector.extract_strided_slice %151 {offsets = [1, 0], sizes = [10, 128], strides = [1, 1]} : vector<11x128xf32> to vector<10x128xf32>
    %154 = arith.addf %152, %153 : vector<10x128xf32>
    %155 = vector.extract_strided_slice %154 {offsets = [0, 0], sizes = [8, 128], strides = [1, 1]} : vector<10x128xf32> to vector<8x128xf32>
    %156 = vector.extract_strided_slice %154 {offsets = [2, 0], sizes = [8, 128], strides = [1, 1]} : vector<10x128xf32> to vector<8x128xf32>
    %157 = arith.addf %155, %156 : vector<8x128xf32>
    %c127_i32_45 = arith.constant 127 : i32
    %158 = tpu.dynamic_rotate %157 by %c127_i32_45 dim 1 : vector<8x128xf32>, i32 -> vector<8x128xf32>
    %159 = arith.addf %157, %158 : vector<8x128xf32>
    %c126_i32_46 = arith.constant 126 : i32
    %160 = tpu.dynamic_rotate %159 by %c126_i32_46 dim 1 : vector<8x128xf32>, i32 -> vector<8x128xf32>
    %161 = arith.addf %159, %160 : vector<8x128xf32>
    %162 = vector.extract_strided_slice %161 {offsets = [0, 0], sizes = [8, 17], strides = [1, 1]} : vector<8x128xf32> to vector<8x17xf32>
    %c2 = arith.constant 2 : index
    %c0_47 = arith.constant 0 : index
    %c0_48 = arith.constant 0 : index
    %163 = vector.load %arg3[%c2, %c0_47, %c0_48] : memref<8x8x17xf32, #tpu.memory_space<vmem>>, vector<1x8x17xf32>
    %164 = vector.shape_cast %163 : vector<1x8x17xf32> to vector<8x17xf32>
    %165 = vector.shape_cast %162 : vector<8x17xf32> to vector<1x8x17xf32>
    tpu.vector_store %arg3[%c2, %c0_47, %c0_48], %165 {strides = array<i32>} : memref<8x8x17xf32, #tpu.memory_space<vmem>>, vector<1x8x17xf32>,
    %c3_i32_49 = arith.constant 3 : i32
    %166 = vector.broadcast %c3_i32_49 : i32 to vector<11x128xi32>
    %167 = arith.cmpi eq, %111, %166 : vector<11x128xi32>
    %cst_50 = arith.constant 0.000000e+00 : f32
    %168 = vector.broadcast %cst_50 : f32 to vector<11x128xf32>
    %169 = arith.select %167, %43, %168 : vector<11x128xi1>, vector<11x128xf32>
    %170 = vector.extract_strided_slice %169 {offsets = [0, 0], sizes = [10, 128], strides = [1, 1]} : vector<11x128xf32> to vector<10x128xf32>
    %171 = vector.extract_strided_slice %169 {offsets = [1, 0], sizes = [10, 128], strides = [1, 1]} : vector<11x128xf32> to vector<10x128xf32>
    %172 = arith.addf %170, %171 : vector<10x128xf32>
    %173 = vector.extract_strided_slice %172 {offsets = [0, 0], sizes = [8, 128], strides = [1, 1]} : vector<10x128xf32> to vector<8x128xf32>
    %174 = vector.extract_strided_slice %172 {offsets = [2, 0], sizes = [8, 128], strides = [1, 1]} : vector<10x128xf32> to vector<8x128xf32>
    %175 = arith.addf %173, %174 : vector<8x128xf32>
    %c127_i32_51 = arith.constant 127 : i32
    %176 = tpu.dynamic_rotate %175 by %c127_i32_51 dim 1 : vector<8x128xf32>, i32 -> vector<8x128xf32>
    %177 = arith.addf %175, %176 : vector<8x128xf32>
    %c126_i32_52 = arith.constant 126 : i32
    %178 = tpu.dynamic_rotate %177 by %c126_i32_52 dim 1 : vector<8x128xf32>, i32 -> vector<8x128xf32>
    %179 = arith.addf %177, %178 : vector<8x128xf32>
    %180 = vector.extract_strided_slice %179 {offsets = [0, 0], sizes = [8, 17], strides = [1, 1]} : vector<8x128xf32> to vector<8x17xf32>
    %c3 = arith.constant 3 : index
    %c0_53 = arith.constant 0 : index
    %c0_54 = arith.constant 0 : index
    %181 = vector.load %arg3[%c3, %c0_53, %c0_54] : memref<8x8x17xf32, #tpu.memory_space<vmem>>, vector<1x8x17xf32>
    %182 = vector.shape_cast %181 : vector<1x8x17xf32> to vector<8x17xf32>
    %183 = vector.shape_cast %180 : vector<8x17xf32> to vector<1x8x17xf32>
    tpu.vector_store %arg3[%c3, %c0_53, %c0_54], %183 {strides = array<i32>} : memref<8x8x17xf32, #tpu.memory_space<vmem>>, vector<1x8x17xf32>,
    %c4_i32_55 = arith.constant 4 : i32
    %184 = vector.broadcast %c4_i32_55 : i32 to vector<11x128xi32>
    %185 = arith.cmpi eq, %111, %184 : vector<11x128xi32>
    %cst_56 = arith.constant 0.000000e+00 : f32
    %186 = vector.broadcast %cst_56 : f32 to vector<11x128xf32>
    %187 = arith.select %185, %43, %186 : vector<11x128xi1>, vector<11x128xf32>
    %188 = vector.extract_strided_slice %187 {offsets = [0, 0], sizes = [10, 128], strides = [1, 1]} : vector<11x128xf32> to vector<10x128xf32>
    %189 = vector.extract_strided_slice %187 {offsets = [1, 0], sizes = [10, 128], strides = [1, 1]} : vector<11x128xf32> to vector<10x128xf32>
    %190 = arith.addf %188, %189 : vector<10x128xf32>
    %191 = vector.extract_strided_slice %190 {offsets = [0, 0], sizes = [8, 128], strides = [1, 1]} : vector<10x128xf32> to vector<8x128xf32>
    %192 = vector.extract_strided_slice %190 {offsets = [2, 0], sizes = [8, 128], strides = [1, 1]} : vector<10x128xf32> to vector<8x128xf32>
    %193 = arith.addf %191, %192 : vector<8x128xf32>
    %c127_i32_57 = arith.constant 127 : i32
    %194 = tpu.dynamic_rotate %193 by %c127_i32_57 dim 1 : vector<8x128xf32>, i32 -> vector<8x128xf32>
    %195 = arith.addf %193, %194 : vector<8x128xf32>
    %c126_i32_58 = arith.constant 126 : i32
    %196 = tpu.dynamic_rotate %195 by %c126_i32_58 dim 1 : vector<8x128xf32>, i32 -> vector<8x128xf32>
    %197 = arith.addf %195, %196 : vector<8x128xf32>
    %198 = vector.extract_strided_slice %197 {offsets = [0, 0], sizes = [8, 17], strides = [1, 1]} : vector<8x128xf32> to vector<8x17xf32>
    %c4 = arith.constant 4 : index
    %c0_59 = arith.constant 0 : index
    %c0_60 = arith.constant 0 : index
    %199 = vector.load %arg3[%c4, %c0_59, %c0_60] : memref<8x8x17xf32, #tpu.memory_space<vmem>>, vector<1x8x17xf32>
    %200 = vector.shape_cast %199 : vector<1x8x17xf32> to vector<8x17xf32>
    %201 = vector.shape_cast %198 : vector<8x17xf32> to vector<1x8x17xf32>
    tpu.vector_store %arg3[%c4, %c0_59, %c0_60], %201 {strides = array<i32>} : memref<8x8x17xf32, #tpu.memory_space<vmem>>, vector<1x8x17xf32>,
    %c5_i32_61 = arith.constant 5 : i32
    %202 = vector.broadcast %c5_i32_61 : i32 to vector<11x128xi32>
    %203 = arith.cmpi eq, %111, %202 : vector<11x128xi32>
    %cst_62 = arith.constant 0.000000e+00 : f32
    %204 = vector.broadcast %cst_62 : f32 to vector<11x128xf32>
    %205 = arith.select %203, %43, %204 : vector<11x128xi1>, vector<11x128xf32>
    %206 = vector.extract_strided_slice %205 {offsets = [0, 0], sizes = [10, 128], strides = [1, 1]} : vector<11x128xf32> to vector<10x128xf32>
    %207 = vector.extract_strided_slice %205 {offsets = [1, 0], sizes = [10, 128], strides = [1, 1]} : vector<11x128xf32> to vector<10x128xf32>
    %208 = arith.addf %206, %207 : vector<10x128xf32>
    %209 = vector.extract_strided_slice %208 {offsets = [0, 0], sizes = [8, 128], strides = [1, 1]} : vector<10x128xf32> to vector<8x128xf32>
    %210 = vector.extract_strided_slice %208 {offsets = [2, 0], sizes = [8, 128], strides = [1, 1]} : vector<10x128xf32> to vector<8x128xf32>
    %211 = arith.addf %209, %210 : vector<8x128xf32>
    %c127_i32_63 = arith.constant 127 : i32
    %212 = tpu.dynamic_rotate %211 by %c127_i32_63 dim 1 : vector<8x128xf32>, i32 -> vector<8x128xf32>
    %213 = arith.addf %211, %212 : vector<8x128xf32>
    %c126_i32_64 = arith.constant 126 : i32
    %214 = tpu.dynamic_rotate %213 by %c126_i32_64 dim 1 : vector<8x128xf32>, i32 -> vector<8x128xf32>
    %215 = arith.addf %213, %214 : vector<8x128xf32>
    %216 = vector.extract_strided_slice %215 {offsets = [0, 0], sizes = [8, 17], strides = [1, 1]} : vector<8x128xf32> to vector<8x17xf32>
    %c5 = arith.constant 5 : index
    %c0_65 = arith.constant 0 : index
    %c0_66 = arith.constant 0 : index
    %217 = vector.load %arg3[%c5, %c0_65, %c0_66] : memref<8x8x17xf32, #tpu.memory_space<vmem>>, vector<1x8x17xf32>
    %218 = vector.shape_cast %217 : vector<1x8x17xf32> to vector<8x17xf32>
    %219 = vector.shape_cast %216 : vector<8x17xf32> to vector<1x8x17xf32>
    tpu.vector_store %arg3[%c5, %c0_65, %c0_66], %219 {strides = array<i32>} : memref<8x8x17xf32, #tpu.memory_space<vmem>>, vector<1x8x17xf32>,
    %c6_i32_67 = arith.constant 6 : i32
    %220 = vector.broadcast %c6_i32_67 : i32 to vector<11x128xi32>
    %221 = arith.cmpi eq, %111, %220 : vector<11x128xi32>
    %cst_68 = arith.constant 0.000000e+00 : f32
    %222 = vector.broadcast %cst_68 : f32 to vector<11x128xf32>
    %223 = arith.select %221, %43, %222 : vector<11x128xi1>, vector<11x128xf32>
    %224 = vector.extract_strided_slice %223 {offsets = [0, 0], sizes = [10, 128], strides = [1, 1]} : vector<11x128xf32> to vector<10x128xf32>
    %225 = vector.extract_strided_slice %223 {offsets = [1, 0], sizes = [10, 128], strides = [1, 1]} : vector<11x128xf32> to vector<10x128xf32>
    %226 = arith.addf %224, %225 : vector<10x128xf32>
    %227 = vector.extract_strided_slice %226 {offsets = [0, 0], sizes = [8, 128], strides = [1, 1]} : vector<10x128xf32> to vector<8x128xf32>
    %228 = vector.extract_strided_slice %226 {offsets = [2, 0], sizes = [8, 128], strides = [1, 1]} : vector<10x128xf32> to vector<8x128xf32>
    %229 = arith.addf %227, %228 : vector<8x128xf32>
    %c127_i32_69 = arith.constant 127 : i32
    %230 = tpu.dynamic_rotate %229 by %c127_i32_69 dim 1 : vector<8x128xf32>, i32 -> vector<8x128xf32>
    %231 = arith.addf %229, %230 : vector<8x128xf32>
    %c126_i32_70 = arith.constant 126 : i32
    %232 = tpu.dynamic_rotate %231 by %c126_i32_70 dim 1 : vector<8x128xf32>, i32 -> vector<8x128xf32>
    %233 = arith.addf %231, %232 : vector<8x128xf32>
    %234 = vector.extract_strided_slice %233 {offsets = [0, 0], sizes = [8, 17], strides = [1, 1]} : vector<8x128xf32> to vector<8x17xf32>
    %c6 = arith.constant 6 : index
    %c0_71 = arith.constant 0 : index
    %c0_72 = arith.constant 0 : index
    %235 = vector.load %arg3[%c6, %c0_71, %c0_72] : memref<8x8x17xf32, #tpu.memory_space<vmem>>, vector<1x8x17xf32>
    %236 = vector.shape_cast %235 : vector<1x8x17xf32> to vector<8x17xf32>
    %237 = vector.shape_cast %234 : vector<8x17xf32> to vector<1x8x17xf32>
    tpu.vector_store %arg3[%c6, %c0_71, %c0_72], %237 {strides = array<i32>} : memref<8x8x17xf32, #tpu.memory_space<vmem>>, vector<1x8x17xf32>,
    %c7_i32_73 = arith.constant 7 : i32
    %238 = vector.broadcast %c7_i32_73 : i32 to vector<11x128xi32>
    %239 = arith.cmpi eq, %111, %238 : vector<11x128xi32>
    %cst_74 = arith.constant 0.000000e+00 : f32
    %240 = vector.broadcast %cst_74 : f32 to vector<11x128xf32>
    %241 = arith.select %239, %43, %240 : vector<11x128xi1>, vector<11x128xf32>
    %242 = vector.extract_strided_slice %241 {offsets = [0, 0], sizes = [10, 128], strides = [1, 1]} : vector<11x128xf32> to vector<10x128xf32>
    %243 = vector.extract_strided_slice %241 {offsets = [1, 0], sizes = [10, 128], strides = [1, 1]} : vector<11x128xf32> to vector<10x128xf32>
    %244 = arith.addf %242, %243 : vector<10x128xf32>
    %245 = vector.extract_strided_slice %244 {offsets = [0, 0], sizes = [8, 128], strides = [1, 1]} : vector<10x128xf32> to vector<8x128xf32>
    %246 = vector.extract_strided_slice %244 {offsets = [2, 0], sizes = [8, 128], strides = [1, 1]} : vector<10x128xf32> to vector<8x128xf32>
    %247 = arith.addf %245, %246 : vector<8x128xf32>
    %c127_i32_75 = arith.constant 127 : i32
    %248 = tpu.dynamic_rotate %247 by %c127_i32_75 dim 1 : vector<8x128xf32>, i32 -> vector<8x128xf32>
    %249 = arith.addf %247, %248 : vector<8x128xf32>
    %c126_i32_76 = arith.constant 126 : i32
    %250 = tpu.dynamic_rotate %249 by %c126_i32_76 dim 1 : vector<8x128xf32>, i32 -> vector<8x128xf32>
    %251 = arith.addf %249, %250 : vector<8x128xf32>
    %252 = vector.extract_strided_slice %251 {offsets = [0, 0], sizes = [8, 17], strides = [1, 1]} : vector<8x128xf32> to vector<8x17xf32>
    %c7 = arith.constant 7 : index
    %c0_77 = arith.constant 0 : index
    %c0_78 = arith.constant 0 : index
    %253 = vector.load %arg3[%c7, %c0_77, %c0_78] : memref<8x8x17xf32, #tpu.memory_space<vmem>>, vector<1x8x17xf32>
    %254 = vector.shape_cast %253 : vector<1x8x17xf32> to vector<8x17xf32>
    %255 = vector.shape_cast %252 : vector<8x17xf32> to vector<1x8x17xf32>
    tpu.vector_store %arg3[%c7, %c0_77, %c0_78], %255 {strides = array<i32>} : memref<8x8x17xf32, #tpu.memory_space<vmem>>, vector<1x8x17xf32>,
    return
  }
  func.func @transform_0(%arg0: i32) -> (i32, i32) {
    %c0_i32 = arith.constant 0 : i32
    %c0_i32_0 = arith.constant 0 : i32
    return %arg0, %c0_i32 : i32, i32
  }
  func.func @transform_1(%arg0: i32) -> (i32, i32) {
    %c1_i32 = arith.constant 1 : i32
    %0 = arith.addi %arg0, %c1_i32 : i32
    %c1_i32_0 = arith.constant 1 : i32
    %1 = arith.muli %0, %c1_i32_0 : i32
    %c0_i32 = arith.constant 0 : i32
    %c0_i32_1 = arith.constant 0 : i32
    return %1, %c0_i32 : i32, i32
  }
  func.func @transform_2(%arg0: i32) -> (i32, i32, i32) {
    %c0_i32 = arith.constant 0 : i32
    %c0_i32_0 = arith.constant 0 : i32
    %c0_i32_1 = arith.constant 0 : i32
    return %c0_i32, %arg0, %c0_i32_0 : i32, i32, i32
  }
}

</mosaic_0001>

<bundles_post_ra>
// kernel: tpu_custom_call.1
= control target key start
LH: loop header
LB: loop body
LE: loop exit
PB: predicated region body
PF: predicated region fallthrough
CT: control target
= control target key end

     0   :  { %7 = vsyncpa [#allocation4], 0  ;;  %s1477_s0 = inlined_call_operand.hbm [shape: f32[32,128], index: 0, kind: input, shape index: {}]   ;;  %s1478_s1 = inlined_call_operand.hbm [shape: f32[32,128], index: 1, kind: input, shape index: {}]   ;;  %s1479_s2 = inlined_call_operand.vmem [shape: f32[8,17,17], index: 2, kind: output, shape index: {}]  }
   0x1   :  { %9 = vsyncpa [#allocation4 + $0x1], 0 }
   0x2   :  { %10 = vsyncpa [#allocation6], 0 }
   0x3   :  { %12 = vsyncpa [#allocation6 + $0x1], 0  ;;  %s1059_s9 = smov 0   ;;  %s1061_s10 = smov 0  }
   0x4   :  { %s1063_s11 = smov 0   ;;  %s1065_s12 = smov 0  }
   0x5   :  { %s1067_s13 = smov 0   ;;  %s1069_s14 = smov 0  }
   0x6   :  { %s1071_s15 = smov 0  }
   0x7 LB: > { %s1093_s16 = sadd.s32 4294967295, %s1039_s15   ;;  %s1096_s17 = sadd.s32 1, %s1039_s15   ;;  %s1039_s15 = sphi %s1071_s15, %s1519_s15   ;;  %s1035_s14 = sphi %s1069_s14, %s1518_s14   ;;  %s1031_s13 = sphi %s1067_s13, %s1517_s13   ;;  %s1027_s12 = sphi %s1065_s12, %s1516_s12   ;;  %s1023_s11 = sphi %s1063_s11, %s1515_s11   ;;  %s1019_s10 = sphi %s1061_s10, %s1514_s10   ;;  %s1015_s9 = sphi %s1059_s9, %s1513_s9  }
   0x8   : > { %s22_s18 = ssub.s32 %s1039_s15, %s1096_s17  ;;  %s25_s19 = sadd.s32 1, %s1035_s14 }
   0x9   : > { %p23_p0 = scmp.eq.s32.totalorder %s22_s18, 0  ;;  %p32_p1 = scmp.ne.s32.totalorder %s1035_s14, %s1031_s13 }
   0xa   : > { %p33_p2 = scmp.eq.s32.totalorder %s1039_s15, 0  ;;  %p38_p3 = scmp.ne.s32.totalorder %s1031_s13, %s1027_s12 }
   0xb   : > { %s1106_s20 = scalar_select %p23_p0, %s1035_s14, %s25_s19  }
   0xc   : > { %p1110_p4 = por %p33_p2, %p32_p1  ;;  %p1481_p5 = scmp.eq.s32.totalorder %s1093_s16, 0 }
   0xd   : > { %p90_p6 = scmp.eq.s32.totalorder %s1093_s16, 2  ;;  %p1480_p8 = scmp.lt.s32.totalorder %s1039_s15, 3 }
   0xe   : > { %p1118_p7 = por %p1481_p5, %p38_p3  ;;  %s116_s24 = sand.u32 1, %s1035_s14  }
   0xf   : > { %p1123_p9 = por %p90_p6, %p32_p1  ;;  %s821_s25 = sshll.u32 %s116_s24, 3 }
  0x10   : > { %s822_s26 = sshll.u32 %s1039_s15, 3  ;;  %s120_s30 = scalar_lea.vmem [#allocation3], %s821_s25 }
  0x11   : > { %s124_s29 = scalar_lea.hbm %s1477_s0, %s822_s26  ;;  %s128_s3 = sshll.u32 %s120_s30, 4  ;;  %s129_s3 = int_to_ptr.vmem [resolvable:$true] %s128_s3 }
  0x12   : > { %s126_s4 = sshll.u32 %s124_s29, 4  ;;  %p1138_p10 = pnand %p1480_p8, %p1110_p4  ;;  %s127_s4 = int_to_ptr.hbm [resolvable:$true] %s126_s4 }
  0x13   : > { %p825_p11 = scmp.ge.s32.totalorder %s1039_s15, 1  ;;  %p153_p12 = scmp.lt.s32.totalorder %s1039_s15, 4 }
  0x14   : > { %s117_s6 = scalar_lea.sflag [#allocation4], %s116_s24  ;;  %s917_s7 = sshra.s32 %s127_s4, 4  ;;  %s918_s7 = int_to_ptr.hbm [resolvable:$true] %s917_s7 }
  0x15   : > { %s919_s8 = scalar_lea.hbm %s918_s7, 8  ;;  %p921_p0 = pneg %p1138_p10 }
  0x16   : > { %p920_p13 = scmp.ne.s32.totalorder %s918_s7, %s919_s8  ;;  %s924_s19 = scalar_lea.hbm %s1477_s0, 32 }
  0x17   : > { %p925_p4 = scmp.lt.s32.totalorder %s918_s7, %s1477_s0  ;;  %p926_p6 = scmp.lt.s32.totalorder %s924_s19, %s919_s8 }
  0x18   : > { %p922_p1 = pnand %p921_p0, %p920_p13 }
  0x19   : > { %p927_p8 = por %p926_p6, %p925_p4 }
  0x1a   : > { %p923_p3 = pneg %p922_p1 }
  0x1c   : > { %p928_p5 = pnand %p927_p8, %p923_p3 }
  0x1e   : > { %931 = shalt.err (!%p928_p5)
}
  0x1f   : > { %849 = dma.hbm_to_vmem [thread:$0]  (!%p1138_p10), %s127_s4, 128, %s129_s3, %s117_s6  }
  0x20   : > { %p1158_p5 = pnand %p825_p11, %p153_p12  ;;  %s49_s27 = sadd.s32 1, %s1096_s17 }
  0x21   : > { %s53_s28 = sadd.s32 1, %s1023_s11  ;;  %s50_s29 = ssub.s32 %s1096_s17, %s49_s27 }
  0x22   : > { %p60_p8 = scmp.ne.s32.totalorder %s1023_s11, %s1019_s10  ;;  %p51_p13 = scmp.eq.s32.totalorder %s50_s29, 0 }
  0x23   : > { %p66_p0 = scmp.ne.s32.totalorder %s1019_s10, %s1015_s9  ;;  %s135_s30 = sand.u32 1, %s1023_s11  }
  0x24   : > { %s1171_s5 = scalar_select %p51_p13, %s1023_s11, %s53_s28  }
  0x25   : > { %p62_p1 = por %p60_p8, %p33_p2  ;;  %p1489_p3 = scmp.eq.s32.totalorder %s1093_s16, 0 }
  0x26   : > { %s823_s4 = sshll.u32 %s135_s30, 3  ;;  %s759_s8 = scalar_lea.hbm %s1478_s1, %s822_s26 }
  0x27   : > { %p1177_p10 = por %p66_p0, %p1489_p3  ;;  %s760_s12 = scalar_lea.hbm %s759_s8, 8 }
  0x28   : > { %s146_s18 = sshll.u32 %s760_s12, 4  ;;  %s139_s19 = scalar_lea.vmem [#allocation5], %s823_s4  ;;  %s147_s18 = int_to_ptr.hbm [resolvable:$true] %s146_s18 }
  0x29   : > { %s148_s9 = sshll.u32 %s139_s19, 4  ;;  %p1491_p11 = scmp.lt.s32.totalorder %s1039_s15, 3  ;;  %s149_s9 = int_to_ptr.vmem [resolvable:$true] %s148_s9 }
  0x2a   : > { %s136_s25 = scalar_lea.sflag [#allocation6], %s135_s30  ;;  %s947_s27 = sshra.s32 %s147_s18, 4  ;;  %s948_s27 = int_to_ptr.hbm [resolvable:$true] %s947_s27 }
  0x2b   : > { %p1188_p12 = pnand %p1491_p11, %p62_p1  ;;  %s949_s28 = scalar_lea.hbm %s948_s27, 8 }
  0x2c   : > { %p950_p2 = scmp.ne.s32.totalorder %s948_s27, %s949_s28  ;;  %s954_s4 = scalar_lea.hbm %s1478_s1, 32 }
  0x2d   : > { %p951_p4 = pneg %p1188_p12  ;;  %p955_p13 = scmp.lt.s32.totalorder %s948_s27, %s1478_s1 }
  0x2e   : > { %p956_p0 = scmp.lt.s32.totalorder %s954_s4, %s949_s28 }
  0x2f   : > { %p952_p6 = pnand %p951_p4, %p950_p2 }
  0x30   : > { %p957_p1 = por %p956_p0, %p955_p13 }
  0x31   : > { %p953_p8 = pneg %p952_p6 }
  0x33   : > { %p958_p3 = pnand %p957_p1, %p953_p8 }
  0x35   : > { %961 = shalt.err (!%p958_p3)
}
  0x36   : > { %852 = dma.hbm_to_vmem [thread:$0]  (!%p1188_p12), %s147_s18, 128, %s149_s9, %s136_s25  }
  0x37   : > { %157 = sbr.rel (%p1158_p5) target bundleno = 510 (0x1fe), region = 28  ;;  %s1205_s30 = sand.u32 (!%p1158_p5), 1, %s1031_s13  }
  0x38   : > { %s826_s7 = sshll.u32 (!%p1158_p5), %s1205_s30, 3  ;;  %s160_s8 = scalar_lea.sflag (!%p1158_p5), [#allocation4], %s1205_s30 }
  0x39   : > { %s163_s12 = scalar_lea.vmem (!%p1158_p5), [#allocation3], %s826_s7 }
  0x3c   : > { %1006 = dma.done.wait (%p1118_p7), %s160_s8, 128  }
  0x3d   : > { %1008 = vsyncadd (%p1118_p7), %s160_s8, 4294967168  ;;  %s169_s18 = sand.u32 1, %s1019_s10  }
  0x3e   : > { %s827_s19 = sshll.u32 %s169_s18, 3  ;;  %s170_s24 = scalar_lea.sflag [#allocation6], %s169_s18 }
  0x3f   : > { %s173_s9 = scalar_lea.vmem [#allocation5], %s827_s19 }
  0x40   : > { %1010 = dma.done.wait (%p1177_p10), %s170_s24, 128  }
  0x41   : > { %1012 = vsyncadd (%p1177_p10), %s170_s24, 4294967168  ;;  %v200_v0 = vld [vmem:[%s163_s12] sm:$0xff]  ;;  %v202_v1 = vld [vmem:[%s173_s9] sm:$0xff]  ;;  %vm228_vm0 = vcmask 1041408   ;;  %vm1483_vm1 = vcmask 1046528   ;;  %vm1482_vm2 = vcmask 1045504   ;;  %v279_v37 = vlaneseq }
  0x42   : > { %v229_v2 = vrot.slane %v200_v0, 6  ;;  %v230_v3 = vrot.slane %v202_v1, 6  ;;  %v206_v4 = vmul.f32 2.0, %v200_v0  ;;  %v207_v5 = vmul.f32 2.0, %v202_v1  ;;  %s1041_s22 = smov 126   ;;  %s1042_s3 = smov 127  }
  0x43   : > { %v221_v6 = vrot.slane %v200_v0, 2  ;;  %v222_v7 = vrot.slane %v202_v1, 2  ;;  %s829_s21 = sshll.u32 %s1093_s16, 3  ;;  %v280_v50 = vshrl.u32 %v279_v37, 7  ;;  %s828_s27 = sshll.u32 %s1205_s30, 6 }
  0x44   : > { %v231_v8 = vsel %vm228_vm0, %v229_v2, %v230_v3  ;;  %v234_v9 = vsub.f32 %v200_v0, %v229_v2  ;;  %v211_v10 = vrot.slane %v206_v4, 1  ;;  %v212_v11 = vrot.slane %v207_v5, 1  ;;  %s1237_s25 = sadd.s32 4294967294, %s829_s21  ;;  %s1422_s28 = scalar_lea.vmem [#allocation7], %s828_s27 }
  0x45   : > { %v235_v12 = vsub.f32 %v202_v1, %v231_v8  ;;  %v223_v15 = vsel %vm1482_vm2, %v221_v6, %v222_v7  ;;  %s670_s4 = scalar_lea.vmem (%p1123_p9), %s1479_s2, %s829_s21 }
  0x46   : > { %v244_v13 = vrot.slane %v234_v9, 2  ;;  %v213_v14 = vsel %vm1483_vm1, %v211_v10, %v212_v11  ;;  %v217_v20 = vadd.f32 %v212_v11, %v202_v1  ;;  %v282_v1 = vstv %s1237_s25 }
  0x47   : > { %v245_v16 = vrot.slane %v235_v12, 2  ;;  %v216_v17 = vadd.f32 %v213_v14, %v200_v0  ;;  %v281_v0 = vadd.s32 8, %v280_v50 }
  0x48   : > { %v227_v21 = vadd.f32 %v222_v7, %v217_v20 }
  0x49   : > { %v246_v18 = vsel %vm1482_vm2, %v244_v13, %v245_v16  ;;  %v226_v19 = vadd.f32 %v223_v15, %v216_v17  ;;  %v1252_v17 = vadd.s32 %v282_v1, %v280_v50  ;;  %v1256_v20 = vadd.s32 %v282_v1, %v281_v0 }
  0x4a   : > { %264 = vrot.lane.b32.xlu1 %v246_v18, %s1041_s22  ;;  %249 = vrot.lane.b32.xlu0 %v246_v18, %s1042_s3 }
  0x4b   : > { %236 = vrot.lane.b32.xlu2 %v226_v19, %s1041_s22  ;;  %vm287_vm5 = vcmp.ge.s32.totalorder %v1252_v17, 0  ;;  %vm289_vm6 = vcmp.lt.s32.totalorder %v1252_v17, 16  ;;  %vm288_vm9 = vcmp.ge.s32.totalorder %v1256_v20, 0  ;;  %vm290_vm10 = vcmp.lt.s32.totalorder %v1256_v20, 16 }
  0x52   : > { %266 = vrot.lane.b32.xlu1 %v245_v16, %s1041_s22  ;;  %251 = vrot.lane.b32.xlu0 %v245_v16, %s1042_s3 }
  0x53   : > { %238 = vrot.lane.b32.xlu2 %v227_v21, %s1041_s22 }
  0xa5   : > { %v237_v22 = vpop.permute.xlu2 %236 }
  0xa6   : > { %v240_v33 = vsub.f32 %v237_v22, %v226_v19 }
  0xa8   : > { %v299_v42 = vmul.f32 %v240_v33, %v240_v33  ;;  %v1230_v44 = vmul.f32 0.9238795, %v240_v33  ;;  %v351_v45 = vmul.f32 0.38268343, %v240_v33  ;;  %v370_v46 = vmul.f32 -0.38268343, %v240_v33 }
  0xa9   : > { %v380_v49 = vmul.f32 -0.9238795, %v240_v33 }
  0xad   : > { %v239_v34 = vpop.permute.xlu2 %238 }
  0xae   : > { %v241_v38 = vsub.f32 %v239_v34, %v227_v21  ;;  %v1258_v21 = vand.u32 127, %v279_v37 }
  0xb0   : > { %v300_v52 = vmul.f32 %v241_v38, %v241_v38  ;;  %v1233_v53 = vmul.f32 0.9238795, %v241_v38  ;;  %v1244_v8 = vmul.f32 0.38268343, %v241_v38  ;;  %v381_v19 = vmul.f32 -0.9238795, %v241_v38 }
  0xb1   : > { %vm293_vm11 = vcmp.ge.s32.totalorder %v1258_v21, 2 }
  0xbc   : > { %v265_v23 = vpop.permute.xlu1 %264  ;;  %v250_v24 = vpop.permute.xlu0 %249 }
  0xbd   : > { %v253_v25 = vmul.f32 2.0, %v250_v24  ;;  %v270_v27 = vrot.slane %v265_v23, 6 }
  0xbf   : > { %v257_v26 = vrot.slane %v253_v25, 6  ;;  %v1043_v25 = vmov 0  }
  0xc1   : > { %v262_v28 = vadd.f32 %v257_v26, %v234_v9  ;;  %v371_v9 = vmul.f32 -0.38268343, %v241_v38 }
  0xc3   : > { %v275_v31 = vadd.f32 %v270_v27, %v262_v28 }
  0xc4   : > { %v252_v29 = vpop.permute.xlu0 %251  ;;  %v267_v30 = vpop.permute.xlu1 %266 }
  0xc5   : > { %v254_v32 = vmul.f32 2.0, %v252_v29  ;;  %v271_v35 = vrot.slane %v267_v30, 6  ;;  %v301_v39 = vmul.f32 %v275_v31, %v275_v31  ;;  %v340_v40 = vmul.f32 0.38268343, %v275_v31 }
  0xc6   : > { %v353_v47 = vmul.f32 0.9238795, %v275_v31  ;;  %v390_v56 = vmul.f32 -0.38268343, %v275_v31  ;;  %v407_v57 = vmul.f32 -0.9238795, %v275_v31 }
  0xc7   : > { %v258_v36 = vrot.slane %v254_v32, 6  ;;  %v272_v48 = vsel %vm228_vm0, %v270_v27, %v271_v35  ;;  %v305_v54 = vrot.slane %v301_v39, 2  ;;  %v344_v55 = vrot.slane %v340_v40, 2 }
  0xc8   : > { %v357_v62 = vrot.slane %v353_v47, 2  ;;  %v394_v6 = vrot.slane %v390_v56, 2  ;;  %v411_v10 = vrot.slane %v407_v57, 2 }
  0xc9   : > { %v259_v41 = vsel %vm228_vm0, %v257_v26, %v258_v36 }
  0xca   : > { %v263_v43 = vadd.f32 %v259_v41, %v235_v12 }
  0xcc   : > { %v276_v51 = vadd.f32 %v272_v48, %v263_v43 }
  0xce   : > { %v302_v58 = vmul.f32 %v276_v51, %v276_v51  ;;  %v341_v59 = vmul.f32 0.38268343, %v276_v51  ;;  %v354_v60 = vmul.f32 0.9238795, %v276_v51  ;;  %v391_v61 = vmul.f32 -0.38268343, %v276_v51 }
  0xcf   : > { %v408_v63 = vmul.f32 -0.9238795, %v276_v51 }
  0xd0   : > { %v306_v2 = vrot.slane %v302_v58, 2  ;;  %v345_v3 = vrot.slane %v341_v59, 2  ;;  %v358_v4 = vrot.slane %v354_v60, 2  ;;  %v1240_v5 = vrot.slane %v391_v61, 2 }
  0xd1   : > { %v1242_v7 = vrot.slane %v408_v63, 2 }
  0xd2   : > { %v307_v11 = vsel %vm1482_vm2, %v305_v54, %v306_v2  ;;  %v346_v12 = vsel %vm1482_vm2, %v344_v55, %v345_v3  ;;  %v359_v13 = vsel %vm1482_vm2, %v357_v62, %v358_v4  ;;  %v396_v18 = vsel %vm1482_vm2, %v394_v6, %v1240_v5 }
  0xd3   : > { %v1249_v14 = vadd.f32 %v307_v11, %v299_v42  ;;  %v349_v15 = vadd.f32 %v346_v12, %v1230_v44  ;;  %v362_v16 = vadd.f32 %v359_v13, %v351_v45  ;;  %v413_v22 = vsel %vm1482_vm2, %v411_v10, %v1242_v7 }
  0xd4   : > { %v372_v23 = vadd.f32 %v370_v46, %v359_v13  ;;  %v1263_v27 = vadd.f32 %v306_v2, %v300_v52  ;;  %v350_v28 = vadd.f32 %v345_v3, %v1233_v53  ;;  %v382_v29 = vadd.f32 %v380_v49, %v346_v12 }
  0xd5   : > { %913 = vrsqrt.f32 %v1249_v14  ;;  %vm364_vm3 = vcmp.gt.f32.partialorder %v362_v16, %v349_v15  ;;  %v399_v30 = vadd.f32 %v396_v18, %v380_v49  ;;  %v363_v31 = vadd.f32 %v358_v4, %v1244_v8 }
  0xd6   : > { %v366_v24 = vsel %vm364_vm3, %v362_v16, %v349_v15  ;;  %v368_v26 = vsel %vm364_vm3, 1, %v1043_v25  ;;  %v416_v34 = vadd.f32 %v413_v22, %v370_v46  ;;  %915 = vrsqrt.f32 %v1263_v27 }
  0xd7   : > { %vm374_vm4 = vcmp.gt.f32.partialorder %v372_v23, %v366_v24  ;;  %v424_v35 = vadd.f32 %v413_v22, %v351_v45  ;;  %vm365_vm8 = vcmp.gt.f32.partialorder %v363_v31, %v350_v28  ;;  %v373_v36 = vadd.f32 %v371_v9, %v358_v4 }
  0xd8   : > { %v376_v32 = vsel %vm374_vm4, %v372_v23, %v366_v24  ;;  %v378_v33 = vsel %vm374_vm4, 2, %v368_v26  ;;  %v367_v39 = vsel %vm365_vm8, %v363_v31, %v350_v28  ;;  %v369_v40 = vsel %vm365_vm8, 1, %v1043_v25  ;;  %vm291_vm8 = vmand %vm287_vm5, %vm289_vm6 }
  0xd9   : > { %vm384_vm7 = vcmp.gt.f32.partialorder %v382_v29, %v376_v32  ;;  %vm375_vm13 = vcmp.gt.f32.partialorder %v373_v36, %v367_v39  ;;  %v383_v42 = vadd.f32 %v381_v19, %v345_v3  ;;  %v400_v43 = vadd.f32 %v1240_v5, %v381_v19  ;;  %vm294_vm5 = vmand %vm291_vm8, %vm293_vm11 }
  0xda   : > { %v386_v37 = vsel %vm384_vm7, %v382_v29, %v376_v32  ;;  %v388_v38 = vsel %vm384_vm7, 3, %v378_v33  ;;  %v377_v47 = vsel %vm375_vm13, %v373_v36, %v367_v39  ;;  %v379_v48 = vsel %vm375_vm13, 2, %v369_v40  ;;  %vm292_vm13 = vmand %vm288_vm9, %vm290_vm10 }
  0xdb   : > { %v914_v41 = vpop.eup %913  ;;  %vm401_vm12 = vcmp.gt.f32.partialorder %v399_v30, %v386_v37  ;;  %vm385_vm15 = vcmp.gt.f32.partialorder %v383_v42, %v377_v47  ;;  %v417_v49 = vadd.f32 %v1242_v7, %v371_v9  ;;  %v432_v60 = vadd.f32 %v396_v18, %v1230_v44  ;;  %vm1302_vm9 = vmand %vm292_vm13, %vm293_vm11 }
  0xdc   : > { %v403_v46 = vsel %vm401_vm12, %v399_v30, %v386_v37  ;;  %v405_v45 = vsel %vm401_vm12, 4, %v388_v38  ;;  %v313_v50 = vmul.f32 %v914_v41, %v1249_v14  ;;  %v916_v51 = vpop.eup %915  ;;  %v387_v55 = vsel %vm385_vm15, %v383_v42, %v377_v47 }
  0xdd   : > { %vm418_vm14 = vcmp.gt.f32.partialorder %v416_v34, %v403_v46  ;;  %v389_v56 = vsel %vm385_vm15, 3, %v379_v48  ;;  %v325_v57 = vmul.f32 %v916_v51, %v1263_v27  ;;  %vm402_vm3 = vcmp.gt.f32.partialorder %v400_v43, %v387_v55 }
  0xde   : > { %v420_v52 = vsel %vm418_vm14, %v416_v34, %v403_v46  ;;  %v422_v54 = vsel %vm418_vm14, 5, %v405_v45  ;;  %v314_v58 = vmul.f32 %v914_v41, %v313_v50  ;;  %v404_v61 = vsel %vm402_vm3, %v400_v43, %v387_v55 }
  0xdf   : > { %vm426_vm0 = vcmp.gt.f32.partialorder %v424_v35, %v420_v52  ;;  %v406_v62 = vsel %vm402_vm3, 4, %v389_v56  ;;  %vm419_vm4 = vcmp.gt.f32.partialorder %v417_v49, %v404_v61  ;;  %v425_v0 = vadd.f32 %v1242_v7, %v1244_v8 }
  0xe0   : > { %v428_v59 = vsel %vm426_vm0, %v424_v35, %v420_v52  ;;  %v430_v63 = vsel %vm426_vm0, 6, %v422_v54  ;;  %v315_v1 = vmul.f32 0.5, %v314_v58  ;;  %v421_v2 = vsel %vm419_vm4, %v417_v49, %v404_v61 }
  0xe1   : > { %vm434_vm7 = vcmp.gt.f32.partialorder %v432_v60, %v428_v59  ;;  %v423_v3 = vsel %vm419_vm4, 5, %v406_v62  ;;  %v326_v4 = vmul.f32 %v916_v51, %v325_v57  ;;  %vm427_vm12 = vcmp.gt.f32.partialorder %v425_v0, %v421_v2 }
  0xe2   : > { %v433_v44 = vadd.f32 %v1240_v5, %v1233_v53  ;;  %v316_v6 = vsub.f32 1.5, %v315_v1  ;;  %v429_v9 = vsel %vm427_vm12, %v425_v0, %v421_v2  ;;  %v431_v10 = vsel %vm427_vm12, 6, %v423_v3 }
  0xe3   : > { %vm296_vm14 = vcmp.lt.s32.totalorder %v1258_v21, 18  ;;  %v327_v7 = vmul.f32 0.5, %v326_v4  ;;  %v1291_v8 = vsel %vm434_vm7, 7, %v430_v63  ;;  %vm319_vm6 = vcmp.eq.f32.partialorder %v1249_v14, inf }
  0xe4   : > { %vm435_vm15 = vcmp.gt.f32.partialorder %v433_v44, %v429_v9  ;;  %v317_v11 = vmul.f32 %v914_v41, %v316_v6  ;;  %vm321_vm0 = vcmp.eq.f32.partialorder %v1249_v14, 0.0  ;;  %v322_v5 = vand.u32 2147483648, %v1249_v14  ;;  %vm297_vm4 = vmand %vm294_vm5, %vm296_vm14 }
  0xe5   : > { %v1296_v53 = vsel %vm435_vm15, 7, %v431_v10  ;;  %v328_v12 = vsub.f32 1.5, %v327_v7  ;;  %vm331_vm10 = vcmp.eq.f32.partialorder %v1263_v27, inf  ;;  %vm333_vm3 = vcmp.eq.f32.partialorder %v1263_v27, 0.0 }
  0xe6   : > { %v318_v15 = vmul.f32 %v317_v11, %v1249_v14  ;;  %v334_v16 = vand.u32 2147483648, %v1263_v27  ;;  %vm494_vm7 = vcmp.eq.s32.totalorder %v1291_v8, 2  ;;  %vm466_vm8 = vcmp.eq.s32.totalorder %v1291_v8, 1 }
  0xe7   : > { %v329_v17 = vmul.f32 %v916_v51, %v328_v12  ;;  %vm438_vm11 = vcmp.eq.s32.totalorder %v1291_v8, 0  ;;  %vm578_vm15 = vcmp.eq.s32.totalorder %v1291_v8, 5  ;;  %vm439_vm5 = vcmp.eq.s32.totalorder %v1296_v53, 0 }
  0xe8   : > { %v320_v18 = vsel %vm319_vm6, %v1249_v14, %v318_v15  ;;  %vm579_vm2 = vcmp.eq.s32.totalorder %v1296_v53, 5  ;;  %vm298_vm6 = vmand %vm1302_vm9, %vm296_vm14  ;;  %vm550_vm1 = vcmp.eq.s32.totalorder %v1291_v8, 4  ;;  %vm551_vm13 = vcmp.eq.s32.totalorder %v1296_v53, 4 }
  0xe9   : > { %v323_v19 = vsel %vm321_vm0, %v322_v5, %v320_v18  ;;  %v330_v20 = vmul.f32 %v329_v17, %v1263_v27  ;;  %vm522_vm12 = vcmp.eq.s32.totalorder %v1291_v8, 3  ;;  %vm523_vm14 = vcmp.eq.s32.totalorder %v1296_v53, 3 }
  0xea   : > { %v1328_v22 = vsel %vm297_vm4, %v323_v19, 0.0  ;;  %vm1495_vm0 = vcmp.eq.s32.totalorder %v1296_v53, 2  ;;  %vm1496_vm9 = vcmp.eq.s32.totalorder %v1296_v53, 1 }
  0xeb   : > { %v332_v14 = vsel %vm331_vm10, %v1263_v27, %v330_v20  ;;  %v496_v23 = vsel %vm494_vm7, %v1328_v22, 0.0  ;;  %v468_v21 = vsel %vm466_vm8, %v1328_v22, 0.0  ;;  %v440_v24 = vsel %vm438_vm11, %v1328_v22, 0.0 }
  0xec   : > { %v335_v25 = vsel %vm333_vm3, %v334_v16, %v332_v14  ;;  %v500_v26 = vrot.slane %v496_v23, 1  ;;  %v472_v28 = vrot.slane %v468_v21, 1  ;;  %v444_v30 = vrot.slane %v440_v24, 1 }
  0xed   : > { %v1348_v29 = vsel %vm298_vm6, %v335_v25, 0.0  ;;  %v580_v31 = vsel %vm578_vm15, %v1328_v22, 0.0  ;;  %v552_v32 = vsel %vm550_vm1, %v1328_v22, 0.0  ;;  %v524_v43 = vsel %vm522_vm12, %v1328_v22, 0.0 }
  0xee   : > { %v497_v33 = vsel %vm1495_vm0, %v1348_v29, 0.0  ;;  %v469_v27 = vsel %vm1496_vm9, %v1348_v29, 0.0  ;;  %v441_v34 = vsel %vm439_vm5, %v1348_v29, 0.0  ;;  %v581_v35 = vsel %vm579_vm2, %v1348_v29, 0.0 }
  0xef   : > { %v501_v36 = vrot.slane %v497_v33, 1  ;;  %v473_v37 = vrot.slane %v469_v27, 1  ;;  %v445_v38 = vrot.slane %v441_v34, 1  ;;  %v584_v39 = vrot.slane %v580_v31, 1 }
  0xf0   : > { %v585_v40 = vrot.slane %v581_v35, 1  ;;  %v553_v41 = vsel %vm551_vm13, %v1348_v29, 0.0  ;;  %v556_v42 = vrot.slane %v552_v32, 1  ;;  %vm634_vm1 = vcmp.eq.s32.totalorder %v1291_v8, 7 }
  0xf1   : > { %vm1497_vm10 = vcmask 1046528   ;;  %v506_v45 = vadd.f32 %v501_v36, %v497_v33  ;;  %v478_v48 = vadd.f32 %v473_v37, %v469_v27  ;;  %vm635_vm3 = vcmp.eq.s32.totalorder %v1296_v53, 7 }
  0xf2   : > { %v502_v46 = vsel %vm1497_vm10, %v500_v26, %v501_v36  ;;  %vm1498_vm2 = vmmov %vm1497_vm10  ;;  %v450_v52 = vadd.f32 %v445_v38, %v441_v34  ;;  %v525_v57 = vsel %vm523_vm14, %v1348_v29, 0.0  ;;  %vm606_vm8 = vcmp.eq.s32.totalorder %v1291_v8, 6 }
  0xf3   : > { %v474_v47 = vsel %vm1498_vm2, %v472_v28, %v473_v37  ;;  %v505_v49 = vadd.f32 %v502_v46, %v496_v23  ;;  %vm1499_vm4 = vmmov %vm1498_vm2  ;;  %v510_v54 = vrot.slane %v506_v45, 2  ;;  %v482_v60 = vrot.slane %v478_v48, 2 }
  0xf4   : > { %v477_v50 = vadd.f32 %v474_v47, %v468_v21  ;;  %v446_v51 = vsel %vm1499_vm4, %v444_v30, %v445_v38  ;;  %vm1500_vm7 = vmmov %vm1498_vm2  ;;  %v454_v63 = vrot.slane %v450_v52, 2  ;;  %v557_v0 = vrot.slane %v553_v41, 1 }
  0xf5   : > { %v449_v55 = vadd.f32 %v446_v51, %v440_v24  ;;  %v586_v56 = vsel %vm1500_vm7, %v584_v39, %v585_v40  ;;  %v509_v58 = vrot.slane %v505_v49, 2  ;;  %v528_v1 = vrot.slane %v524_v43, 1  ;;  %vm1504_vm15 = vmmov %vm1498_vm2 }
  0xf6   : > { %v481_v59 = vrot.slane %v477_v50, 2  ;;  %v589_v61 = vadd.f32 %v586_v56, %v580_v31  ;;  %vm1501_vm11 = vcmask 1045504   ;;  %v590_v4 = vadd.f32 %v585_v40, %v581_v35  ;;  %vm1505_vm5 = vmmov %vm1498_vm2 }
  0xf7   : > { %v453_v62 = vrot.slane %v449_v55, 2  ;;  %v511_v2 = vsel %vm1501_vm11, %v509_v58, %v510_v54  ;;  %vm1502_vm12 = vmmov %vm1501_vm11  ;;  %v529_v44 = vrot.slane %v525_v57, 1  ;;  %v558_v5 = vsel %vm1504_vm15, %v556_v42, %v557_v0 }
  0xf8   : > { %v483_v3 = vsel %vm1502_vm12, %v481_v59, %v482_v60  ;;  %v513_v6 = vadd.f32 %v511_v2, %v505_v49  ;;  %vm1503_vm13 = vmmov %vm1501_vm11  ;;  %v593_v7 = vrot.slane %v589_v61, 2  ;;  %v562_v12 = vadd.f32 %v557_v0, %v553_v41 }
  0xf9   : > { %v485_v9 = vadd.f32 %v483_v3, %v477_v50  ;;  %v455_v10 = vsel %vm1503_vm13, %v453_v62, %v454_v63  ;;  %v530_v13 = vsel %vm1505_vm5, %v528_v1, %v529_v44  ;;  %v561_v15 = vadd.f32 %v558_v5, %v552_v32  ;;  %vm1506_vm14 = vmmov %vm1501_vm11 }
  0xfa   : > { %v457_v11 = vadd.f32 %v455_v10, %v449_v55  ;;  %514 = vrot.lane.b32.xlu2 %v513_v6, %s1042_s3  ;;  %v533_v16 = vadd.f32 %v530_v13, %v524_v43  ;;  %v636_v17 = vsel %vm634_vm1, %v1328_v22, 0.0  ;;  %vm607_vm6 = vcmp.eq.s32.totalorder %v1296_v53, 6  ;;  %vm1507_vm0 = vmmov %vm1501_vm11 }
  0xfb   : > { %486 = vrot.lane.b32.xlu1 %v485_v9, %s1042_s3  ;;  %v594_v18 = vrot.slane %v590_v4, 2  ;;  %v566_v19 = vrot.slane %v562_v12, 2  ;;  %v534_v20 = vadd.f32 %v529_v44, %v525_v57  ;;  %v637_v14 = vsel %vm635_vm3, %v1348_v29, 0.0  ;;  %vm1508_vm9 = vmmov %vm1498_vm2 }
  0xfc   : > { %458 = vrot.lane.b32.xlu0 %v457_v11, %s1042_s3  ;;  %v565_v23 = vrot.slane %v561_v15, 2  ;;  %v537_v21 = vrot.slane %v533_v16, 2  ;;  %v640_v24 = vrot.slane %v636_v17, 1  ;;  %v641_v25 = vrot.slane %v637_v14, 1  ;;  %vm1509_vm1 = vmmov %vm1507_vm0 }
  0xfd   : > { %v595_v26 = vsel %vm1506_vm14, %v593_v7, %v594_v18  ;;  %v538_v28 = vrot.slane %v534_v20, 2  ;;  %v608_v30 = vsel %vm606_vm8, %v1328_v22, 0.0  ;;  %v609_v31 = vsel %vm607_vm6, %v1348_v29, 0.0  ;;  %vm1510_vm10 = vmmov %vm1498_vm2 }
  0xfe   : > { %v567_v32 = vsel %vm1507_vm0, %v565_v23, %v566_v19  ;;  %v642_v33 = vsel %vm1508_vm9, %v640_v24, %v641_v25  ;;  %v612_v27 = vrot.slane %v608_v30, 1  ;;  %v646_v35 = vadd.f32 %v641_v25, %v637_v14  ;;  %vm1511_vm2 = vmmov %vm1507_vm0 }
  0xff   : > { %v539_v53 = vsel %vm1509_vm1, %v537_v21, %v538_v28  ;;  %v645_v34 = vadd.f32 %v642_v33, %v636_v17  ;;  %v613_v36 = vrot.slane %v609_v31, 1  ;;  %v597_v37 = vadd.f32 %v595_v26, %v589_v61  ;;  %vm1512_vm3 = vmmov %vm1507_vm0 }
 0x100   : > { %v569_v38 = vadd.f32 %v567_v32, %v561_v15  ;;  %v541_v39 = vadd.f32 %v539_v53, %v533_v16  ;;  %v650_v29 = vrot.slane %v646_v35, 2  ;;  %vm464_vm4 = vcmask 138240  }
 0x101   : > { %v649_v40 = vrot.slane %v645_v34, 2  ;;  %v614_v41 = vsel %vm1510_vm10, %v612_v27, %v613_v36  ;;  %v618_v8 = vadd.f32 %v613_v36, %v609_v31 }
 0x102   : > { %598 = vrot.lane.b32.xlu2 %v597_v37, %s1042_s3  ;;  %v617_v22 = vadd.f32 %v614_v41, %v608_v30 }
 0x103   : > { %570 = vrot.lane.b32.xlu1 %v569_v38, %s1042_s3  ;;  %v622_v43 = vrot.slane %v618_v8, 2  ;;  %v651_v46 = vsel %vm1511_vm2, %v649_v40, %v650_v29 }
 0x104   : > { %542 = vrot.lane.b32.xlu0 %v541_v39, %s1042_s3  ;;  %v621_v42 = vrot.slane %v617_v22, 2  ;;  %v653_v47 = vadd.f32 %v651_v46, %v645_v34 }
 0x106   : > { %v623_v45 = vsel %vm1512_vm3, %v621_v42, %v622_v43 }
 0x107   : > { %v625_v48 = vadd.f32 %v623_v45, %v617_v22 }
 0x10b   : > { %654 = vrot.lane.b32.xlu1 %v653_v47, %s1042_s3 }
 0x10c   : > { %626 = vrot.lane.b32.xlu0 %v625_v48, %s1042_s3 }
 0x154   : > { %v515_v49 = vpop.permute.xlu2 %514 }
 0x155   : > { %v516_v50 = vadd.f32 %v515_v49, %v513_v6 }
 0x157   : > { %517 = vrot.lane.b32.xlu1 %v516_v50, %s1041_s22 }
 0x15c   : > { %v599_v51 = vpop.permute.xlu2 %598 }
 0x15d   : > { %v600_v52 = vadd.f32 %v599_v51, %v597_v37 }
 0x15f   : > { %601 = vrot.lane.b32.xlu1 %v600_v52, %s1041_s22 }
 0x16d   : > { %v487_v54 = vpop.permute.xlu1 %486 }
 0x16e   : > { %v488_v55 = vadd.f32 %v487_v54, %v485_v9  ;;  %v459_v56 = vpop.permute.xlu0 %458 }
 0x16f   : > { %v460_v57 = vadd.f32 %v459_v56, %v457_v11 }
 0x170   : > { %489 = vrot.lane.b32.xlu0 %v488_v55, %s1041_s22 }
 0x171   : > { %461 = vrot.lane.b32.xlu2 %v460_v57, %s1041_s22 }
 0x175   : > { %v571_v58 = vpop.permute.xlu1 %570 }
 0x176   : > { %v572_v59 = vadd.f32 %v571_v58, %v569_v38  ;;  %v543_v60 = vpop.permute.xlu0 %542 }
 0x177   : > { %v544_v61 = vadd.f32 %v543_v60, %v541_v39 }
 0x178   : > { %573 = vrot.lane.b32.xlu0 %v572_v59, %s1041_s22 }
 0x179   : > { %545 = vrot.lane.b32.xlu2 %v544_v61, %s1041_s22 }
 0x17d   : > { %v655_v62 = vpop.permute.xlu1 %654 }
 0x17e   : > { %v656_v63 = vadd.f32 %v655_v62, %v653_v47  ;;  %v627_v0 = vpop.permute.xlu0 %626 }
 0x17f   : > { %v628_v1 = vadd.f32 %v627_v0, %v625_v48 }
 0x180   : > { %657 = vrot.lane.b32.xlu0 %v656_v63, %s1041_s22 }
 0x181   : > { %629 = vrot.lane.b32.xlu2 %v628_v1, %s1041_s22 }
 0x1c9   : > { %v518_v2 = vpop.permute.xlu1 %517 }
 0x1ca   : > { %v519_v3 = vadd.f32 %v518_v2, %v516_v50 }
 0x1cb   : > { %v462_v4 = vpop.permute.xlu2 %461 }
 0x1cc   : > { %v463_v44 = vadd.f32 %v462_v4, %v460_v57  ;;  %832 = vst.msk [vmem:[%s1422_s28 + $0x10] sm:$0xff] %vm464_vm4, %v519_v3 }
 0x1ce   : > { %465 = vst.msk [vmem:[%s1422_s28] sm:$0xff] %vm464_vm4, %v463_v44 }
 0x1d1   : > { %v602_v6 = vpop.permute.xlu1 %601 }
 0x1d2   : > { %v603_v9 = vadd.f32 %v602_v6, %v600_v52 }
 0x1d3   : > { %v546_v10 = vpop.permute.xlu2 %545  ;;  %v717_v14 = vld [vmem:[%s1422_s28 + $0x10] sm:$0xff] (%p1123_p9) }
 0x1d4   : > { %v547_v7 = vadd.f32 %v546_v10, %v544_v61  ;;  %835 = vst.msk [vmem:[%s1422_s28 + $0x28] sm:$0xff] %vm464_vm4, %v603_v9 }
 0x1d5   : > { %v713_v19 = vld [vmem:[%s1422_s28] sm:$0xff] (%p1123_p9)  ;;  %718 = vst [vmem:[%s670_s4 + $0x30] sm:$0xff] (%p1123_p9), %v717_v14 }
 0x1d6   : > { %833 = vst.msk [vmem:[%s1422_s28 + $0x18] sm:$0xff] %vm464_vm4, %v547_v7 }
 0x1d7   : > { %714 = vst [vmem:[%s670_s4] sm:$0xff] (%p1123_p9), %v713_v19 }
 0x1db   : > { %v630_v11 = vpop.permute.xlu2 %629  ;;  %v723_v24 = vld [vmem:[%s1422_s28 + $0x28] sm:$0xff] (%p1123_p9) }
 0x1dc   : > { %v631_v5 = vadd.f32 %v630_v11, %v628_v1  ;;  %724 = vst [vmem:[%s670_s4 + $0x78] sm:$0xff] (%p1123_p9), %v723_v24 }
 0x1dd   : > { %v719_v23 = vld [vmem:[%s1422_s28 + $0x18] sm:$0xff] (%p1123_p9) }
 0x1de   : > { %836 = vst.msk [vmem:[%s1422_s28 + $0x30] sm:$0xff] %vm464_vm4, %v631_v5 }
 0x1df   : > { %720 = vst [vmem:[%s670_s4 + $0x48] sm:$0xff] (%p1123_p9), %v719_v23 }
 0x1e2   : > { %v490_v12 = vpop.permute.xlu0 %489 }
 0x1e3   : > { %v491_v13 = vadd.f32 %v490_v12, %v488_v55 }
 0x1e5   : > { %831 = vst.msk [vmem:[%s1422_s28 + $0x8] sm:$0xff] %vm464_vm4, %v491_v13  ;;  %v725_v25 = vld [vmem:[%s1422_s28 + $0x30] sm:$0xff] (%p1123_p9) }
 0x1e6   : > { %726 = vst [vmem:[%s670_s4 + $0x90] sm:$0xff] (%p1123_p9), %v725_v25 }
 0x1ea   : > { %v574_v15 = vpop.permute.xlu0 %573 }
 0x1eb   : > { %v575_v16 = vadd.f32 %v574_v15, %v572_v59 }
 0x1ec   : > { %v715_v20 = vld [vmem:[%s1422_s28 + $0x8] sm:$0xff] (%p1123_p9) }
 0x1ed   : > { %834 = vst.msk [vmem:[%s1422_s28 + $0x20] sm:$0xff] %vm464_vm4, %v575_v16 }
 0x1ee   : > { %716 = vst [vmem:[%s670_s4 + $0x18] sm:$0xff] (%p1123_p9), %v715_v20 }
 0x1f1   : > { %668 = sbr.rel (!%p1123_p9) target bundleno = 510 (0x1fe), region = 40 }
 0x1f2   : > { %v658_v17 = vpop.permute.xlu0 %657 }
 0x1f3   : > { %v659_v18 = vadd.f32 %v658_v17, %v656_v63 }
 0x1f4   : > { %v721_v21 = vld [vmem:[%s1422_s28 + $0x20] sm:$0xff] (%p1123_p9) }
 0x1f5   : > { %837 = vst.msk [vmem:[%s1422_s28 + $0x38] sm:$0xff] %vm464_vm4, %v659_v18 }
 0x1f6   : > { %722 = vst [vmem:[%s670_s4 + $0x60] sm:$0xff] %v721_v21 }
 0x1fc   : > { %v727_v26 = vld [vmem:[%s1422_s28 + $0x38] sm:$0xff] }
 0x1fd   : > { %728 = vst [vmem:[%s670_s4 + $0xa8] sm:$0xff] %v727_v26 }
 0x1fe PF: > { %p15_p7 = scmp.ge.s32.totalorder %s1096_s17, 5   ;;  %s1513_s9 = smov %s1019_s10 }
 0x1ff   : > { %s1514_s10 = smov %s1023_s11  ;;  %s1515_s11 = smov %s1171_s5 }
 0x200   : > { %s1516_s12 = smov %s1031_s13  ;;  %s1517_s13 = smov %s1035_s14 }
 0x201   : > { %s1518_s14 = smov %s1106_s20  ;;  %s1519_s15 = smov %s1096_s17 }
 0x202   :  { %17 = sbr.rel (!%p15_p7) target bundleno = 7 (0x7), region = 126 }
 0x207   :  { %744 = vsyncpa [#allocation4], 1 }
 0x208   :  { %746 = vsyncpa [#allocation4 + $0x1], 1 }
 0x209   :  { %747 = vsyncpa [#allocation6], 1 }
 0x20a   :  { %749 = vsyncpa [#allocation6 + $0x1], 1 }

</bundles_post_ra>
